<compile_context>
chip_gen: v7x
topology: tpu7x:2x2x1
jax: 0.10.0
libtpu: 0.0.40
codegen_flags: <defaults>
</compile_context>

<pallas_src>
import jax
import jax.numpy as jnp
from jax import lax
from jax.experimental import pallas as pl
from jax.experimental.pallas import tpu as pltpu

LANE = 128
SUBLANE = 8
NEG_INF = -1e30


def _round_up(x, m):
    return (x + m - 1) // m * m


def _make_kernel(batch, slot, k_max, v_pad, f_pad):
    """Fused SentenceCnn forward kernel (closure over static sizes)."""
    l_total = batch * slot      # total unfold positions (all sentences, slot is 8-aligned)

    def kernel(ids_ref, emb_ref, wconv_ref, bconv_ref, thr_ref, wlin_ref, out_ref):
        # ---- fused embedding gather: one-hot (L,Vp) @ (Vp,Dp), bf16 inputs / f32 acc ----
        # TODO(synk): for realistic vocab sizes chunk this matmul over V in 128-lane slabs
        # (or keep the gather outside the kernel) so VMEM stays O(L*128) on v7x's 64 MiB.
        ids = ids_ref[...]                                             # (L, 1) int32
        vocab_iota = lax.broadcasted_iota(jnp.int32, (l_total, v_pad), 1)
        onehot = (ids == vocab_iota).astype(jnp.bfloat16)              # exact 0/1
        x = jnp.dot(onehot, emb_ref[...],
                    preferred_element_type=jnp.float32)                # (L, Dp) f32

        # ---- unfold via sublane rolls (XLU) -- no misaligned-slice relayout copies ----
        # Tap i of row l must see x[(l + i) mod L]  ==  jnp.roll(x, -i, axis=0).
        taps = [x if i == 0 else pltpu.roll(x, (l_total - i) % l_total, axis=0)
                for i in range(k_max)]
        unfolded = jnp.concatenate(taps, axis=1).astype(jnp.bfloat16)  # (L, Kmax*Dp)

        # ---- single fused conv matmul for ALL filters / taps (contraction Kmax*Dp) ----
        scores = jnp.dot(unfolded, wconv_ref[...],
                         preferred_element_type=jnp.float32)           # (L, Fp) f32

        # ---- in-kernel validity mask + per-sentence max-pool + bias + ReLU (f32) ----
        scores = scores.reshape(batch, slot, f_pad)                    # slot is 8-aligned
        pos = lax.broadcasted_iota(jnp.int32, (batch, slot, f_pad), 1)
        thr = thr_ref[...].reshape(1, 1, f_pad)                        # per-column S - k
        scores = jnp.where(pos <= thr, scores, NEG_INF)
        feat = jnp.max(scores, axis=1)                                 # (B, Fp)
        feat = jnp.maximum(feat + bconv_ref[...], 0.0)
        # Lane f_total of feat is forced to 1.0 (zero conv weights, bconv==1.0) and carries
        # the fused Linear bias through the final matmul.

        # Dropout is identity at inference.  Linear bias folded into wlin row f_total.
        logits = jnp.dot(feat.astype(jnp.bfloat16), wlin_ref[...],
                         preferred_element_type=jnp.float32)           # (B, Cp)
        out_ref[...] = logits.astype(out_ref.dtype)

    return kernel


def sentence_cnn_forward(token_ids, embedding, conv_params, linear_w, linear_b,
                         filter_lengths):
    """SentenceCnn forward (eval mode). All compute runs inside one Pallas kernel."""
    B, S = token_ids.shape
    V, D = embedding.shape
    C = linear_w.shape[1]
    k_list = tuple(int(k) for k in filter_lengths)
    n_list = tuple(int(w.shape[-1]) for (w, _) in conv_params)
    k_max = max(k_list)
    f_total = sum(n_list)
    if S < k_max:
        # With S < k the PyTorch conv output is empty; the masked-max algebra would silently
        # produce relu(bias) instead, so reject it explicitly.
        raise ValueError("sequence length must be >= max filter length")

    d_pad = _round_up(D, LANE)                 # lane-dense word dim
    v_pad = _round_up(V, LANE)                 # lane-dense one-hot / contraction dim
    f_pad = _round_up(f_total + 1, LANE)       # lane-dense channels (+1 ones-lane for bias)
    c_pad = _round_up(C, LANE)                 # lane-dense logits
    slot = _round_up(S, SUBLANE)               # per-sentence row slot (valid windows < S)
    l_total = B * slot

    # ---------- one-off host/XLA-side packing (weights + ids only) ----------
    emb_p = (jnp.zeros((v_pad, d_pad), jnp.float32)
             .at[:V, :D].set(embedding.astype(jnp.float32))
             .astype(jnp.bfloat16))

    ids_pad = (jnp.zeros((B, slot), jnp.int32)
               .at[:, :S].set(token_ids.astype(jnp.int32))
               .reshape(l_total, 1))

    # Fused, unfolded conv weight: rows [i*Dp, i*Dp+D) of filter f's columns hold tap i
    # (zero rows for taps >= k_f and for D->Dp / F->Fp padding).
    w_unf = jnp.zeros((k_max * d_pad, f_pad), jnp.float32)
    b_conv = jnp.zeros((1, f_pad), jnp.float32)
    thr = jnp.zeros((1, f_pad), jnp.int32)     # per-column max valid position (S - k)
    col = 0
    for (w, b), k, n in zip(conv_params, k_list, n_list):
        for i in range(k):
            w_unf = w_unf.at[i * d_pad:i * d_pad + D, col:col + n].set(
                w[i].astype(jnp.float32))
        b_conv = b_conv.at[0, col:col + n].set(b.reshape(-1).astype(jnp.float32))
        thr = thr.at[0, col:col + n].set(S - k)
        col += n
    b_conv = b_conv.at[0, f_total].set(1.0)    # "ones" lane carrying the fused Linear bias
    w_unf = w_unf.astype(jnp.bfloat16)

    wlin_p = jnp.zeros((f_pad, c_pad), jnp.float32)
    wlin_p = wlin_p.at[:f_total, :C].set(linear_w.astype(jnp.float32))
    wlin_p = wlin_p.at[f_total, :C].set(linear_b.reshape(-1).astype(jnp.float32))
    wlin_p = wlin_p.astype(jnp.bfloat16)

    kernel = _make_kernel(B, slot, k_max, v_pad, f_pad)

    flops = 2 * (l_total * v_pad * d_pad
                 + l_total * (k_max * d_pad) * f_pad
                 + B * f_pad * c_pad)
    bytes_accessed = (4 * l_total + 2 * v_pad * d_pad + 2 * k_max * d_pad * f_pad
                      + 4 * f_pad + 4 * f_pad + 2 * f_pad * c_pad + 4 * B * c_pad)

    # TODO(synk): at realistic B*S, add a grid over the batch axis with
    # dimension_semantics=("parallel",) so both v7x TensorCores are used; gridless is the
    # right call at these toy sizes (grid steps cost ~0.35 us each).
    vmem = pl.BlockSpec(memory_space=pltpu.MemorySpace.VMEM)
    out = pl.pallas_call(
        kernel,
        out_shape=jax.ShapeDtypeStruct((B, c_pad), jnp.float32),
        in_specs=[vmem] * 6,
        out_specs=vmem,
        compiler_params=pltpu.CompilerParams(vmem_limit_bytes=32 * 1024 * 1024),
        cost_estimate=pl.CostEstimate(flops=flops, transcendentals=0,
                                      bytes_accessed=bytes_accessed),
    )(ids_pad, emb_p, w_unf, b_conv, thr, wlin_p)
    return out[:, :C]                          # drop lane padding host-side


def sentence_cnn_reference(token_ids, embedding, conv_params, linear_w, linear_b,
                           filter_lengths):
    """Pure-JAX reference matching the PyTorch module (eval mode)."""
    x = jnp.take(embedding, token_ids, axis=0).astype(jnp.float32)   # (B, S, D)
    S = x.shape[1]
    feats = []
    for (w, b), k in zip(conv_params, filter_lengths):
        L = S - k + 1
        s = sum(jnp.einsum("bld,dn->bln", x[:, i:i + L, :], w[i]) for i in range(k))
        s = jnp.maximum(s + b[None, :, :], 0.0)
        feats.append(jnp.max(s, axis=1))
    feat = jnp.concatenate(feats, axis=-1)
    return feat @ linear_w + linear_b


if __name__ == "__main__":
    # Small, deterministic synthetic setup consistent with the module.
    vocab_size = 50
    word_dim = 32          # D (the conv kernel's second dim)
    seq_len = 16           # S
    batch = 2              # B
    nb_classes = 3
    filter_lengths = (3, 4, 5)
    filter_counts = (8, 8, 8)

    key = jax.random.PRNGKey(0)
    keys = jax.random.split(key, 3 + len(filter_lengths))

    # word_embedding_numpy equivalent (row 0 = padding row, copied as-is, matching the
    # PyTorch code which overwrites the whole embedding weight).
    embedding = jax.random.normal(keys[0], (vocab_size, word_dim), dtype=jnp.float32)
    token_ids = jax.random.randint(keys[1], (batch, seq_len), 0, vocab_size)

    # Conv params: kaiming_normal_(mode='fan_out', relu) -> std = sqrt(2 / fan_out),
    # fan_out = n_f * k * D ; biases zero-initialized. Stored as (k, D, n_f).
    conv_params = []
    for idx, (k, n) in enumerate(zip(filter_lengths, filter_counts)):
        fan_out = n * k * word_dim
        std = (2.0 / fan_out) ** 0.5
        w = std * jax.random.normal(keys[2 + idx], (k, word_dim, n), dtype=jnp.float32)
        b = jnp.zeros((1, n), dtype=jnp.float32)
        conv_params.append((w, b))

    # Linear params: kaiming_normal_ fan_out = nb_classes; bias zero. Stored as (F, C).
    total_filters = sum(filter_counts)
    std_lin = (2.0 / nb_classes) ** 0.5
    linear_w = std_lin * jax.random.normal(keys[-1], (total_filters, nb_classes),
                                           dtype=jnp.float32)
    linear_b = jnp.zeros((1, nb_classes), dtype=jnp.float32)

    logits = sentence_cnn_forward(token_ids, embedding, conv_params,
                                  linear_w, linear_b, filter_lengths)
    logits = jax.block_until_ready(logits)

    ref = sentence_cnn_reference(token_ids, embedding, conv_params,
                                 linear_w, linear_b, filter_lengths)
    assert logits.shape == (batch, nb_classes)
    assert logits.dtype == jnp.float32
    assert bool(jnp.all(jnp.isfinite(logits)))
    # Loose tolerance: kernel uses bf16 matmul inputs with f32 accumulation (deliberate,
    # per perf review); reference uses default-precision XLA matmuls.
    assert bool(jnp.allclose(logits, ref, rtol=0.05, atol=0.1))
    # TODO(synk): training-mode dropout (RNG mask + 1/(1-p) scaling) not implemented;
    # eval-mode identity only.
    print("KERNEL_OK")
</pallas_src>

<mosaic_0001>
module attributes {stable_mosaic.version = 11 : i64} {
  func.func @kernel(%arg0: memref<32x1xi32, #tpu.memory_space<vmem>>, %arg1: memref<128x128xbf16, #tpu.memory_space<vmem>>, %arg2: memref<640x128xbf16, #tpu.memory_space<vmem>>, %arg3: memref<1x128xf32, #tpu.memory_space<vmem>>, %arg4: memref<1x128xi32, #tpu.memory_space<vmem>>, %arg5: memref<128x128xbf16, #tpu.memory_space<vmem>>, %arg6: memref<2x128xf32, #tpu.memory_space<vmem>>) attributes {dimension_semantics = [], scalar_prefetch = 0 : i64, scratch_operands = 0 : i64, tpu.core_type = #tpu.core_type<tc>} {
    %c0 = arith.constant 0 : index
    %c0_0 = arith.constant 0 : index
    %0 = vector.load %arg0[%c0, %c0_0] : memref<32x1xi32, #tpu.memory_space<vmem>>, vector<32x1xi32>
    %1 = tpu.iota {dimensions = array<i32: 1>} : vector<32x128xi32>
    %2 = vector.broadcast %0 : vector<32x1xi32> to vector<32x128xi32>
    %3 = arith.cmpi eq, %2, %1 : vector<32x128xi32>
    %4 = arith.extui %3 : vector<32x128xi1> to vector<32x128xi32>
    %5 = arith.sitofp %4 : vector<32x128xi32> to vector<32x128xf32>
    %6 = arith.truncf %5 : vector<32x128xf32> to vector<32x128xbf16>
    %c0_1 = arith.constant 0 : index
    %c0_2 = arith.constant 0 : index
    %7 = vector.load %arg1[%c0_1, %c0_2] : memref<128x128xbf16, #tpu.memory_space<vmem>>, vector<128x128xbf16>
    %cst = arith.constant dense<0.000000e+00> : vector<32x128xf32>
    %8 = tpu.matmul %6, %7, %cst {dimension_numbers = #tpu.dot_dimension_numbers<[1], [0], [0], [1], [0, 0, 1, 1], [], []>} : vector<32x128xbf16>, vector<128x128xbf16>, vector<32x128xf32> -> vector<32x128xf32>
    %c31_i32 = arith.constant 31 : i32
    %9 = tpu.dynamic_rotate %8 by %c31_i32 dim 0 : vector<32x128xf32>, i32 -> vector<32x128xf32>
    %c30_i32 = arith.constant 30 : i32
    %10 = tpu.dynamic_rotate %8 by %c30_i32 dim 0 : vector<32x128xf32>, i32 -> vector<32x128xf32>
    %c29_i32 = arith.constant 29 : i32
    %11 = tpu.dynamic_rotate %8 by %c29_i32 dim 0 : vector<32x128xf32>, i32 -> vector<32x128xf32>
    %c28_i32 = arith.constant 28 : i32
    %12 = tpu.dynamic_rotate %8 by %c28_i32 dim 0 : vector<32x128xf32>, i32 -> vector<32x128xf32>
    %13 = tpu.concatenate %8, %9, %10, %11, %12 in 1 : vector<32x128xf32>, vector<32x128xf32>, vector<32x128xf32>, vector<32x128xf32>, vector<32x128xf32> -> vector<32x640xf32>
    %14 = arith.truncf %13 : vector<32x640xf32> to vector<32x640xbf16>
    %c0_3 = arith.constant 0 : index
    %c0_4 = arith.constant 0 : index
    %15 = vector.load %arg2[%c0_3, %c0_4] : memref<640x128xbf16, #tpu.memory_space<vmem>>, vector<640x128xbf16>
    %cst_5 = arith.constant dense<0.000000e+00> : vector<32x128xf32>
    %16 = tpu.matmul %14, %15, %cst_5 {dimension_numbers = #tpu.dot_dimension_numbers<[1], [0], [0], [1], [0, 0, 1, 1], [], []>} : vector<32x640xbf16>, vector<640x128xbf16>, vector<32x128xf32> -> vector<32x128xf32>
    %17 = vector.shape_cast %16 : vector<32x128xf32> to vector<2x16x128xf32>
    %18 = tpu.iota {dimensions = array<i32: 1>} : vector<2x16x128xi32>
    %c0_6 = arith.constant 0 : index
    %c0_7 = arith.constant 0 : index
    %19 = vector.load %arg4[%c0_6, %c0_7] : memref<1x128xi32, #tpu.memory_space<vmem>>, vector<1x128xi32>
    %20 = vector.shape_cast %19 : vector<1x128xi32> to vector<1x1x128xi32>
    %21 = vector.broadcast %20 : vector<1x1x128xi32> to vector<2x16x128xi32>
    %22 = arith.cmpi sle, %18, %21 : vector<2x16x128xi32>
    %cst_8 = arith.constant -1.000000e+30 : f32
    %23 = vector.broadcast %cst_8 : f32 to vector<2x16x128xf32>
    %24 = arith.select %22, %17, %23 : vector<2x16x128xi1>, vector<2x16x128xf32>
    %cst_9 = arith.constant dense<0xFF800000> : vector<2x128xf32>
    %25 = vector.multi_reduction <maximumf>, %24, %cst_9 [1] : vector<2x16x128xf32> to vector<2x128xf32>
    %c0_10 = arith.constant 0 : index
    %c0_11 = arith.constant 0 : index
    %26 = vector.load %arg3[%c0_10, %c0_11] : memref<1x128xf32, #tpu.memory_space<vmem>>, vector<1x128xf32>
    %27 = vector.broadcast %26 : vector<1x128xf32> to vector<2x128xf32>
    %28 = arith.addf %25, %27 : vector<2x128xf32>
    %cst_12 = arith.constant 0.000000e+00 : f32
    %29 = vector.broadcast %cst_12 : f32 to vector<2x128xf32>
    %30 = arith.maximumf %28, %29 : vector<2x128xf32>
    %31 = arith.truncf %30 : vector<2x128xf32> to vector<2x128xbf16>
    %c0_13 = arith.constant 0 : index
    %c0_14 = arith.constant 0 : index
    %32 = vector.load %arg5[%c0_13, %c0_14] : memref<128x128xbf16, #tpu.memory_space<vmem>>, vector<128x128xbf16>
    %cst_15 = arith.constant dense<0.000000e+00> : vector<2x128xf32>
    %33 = tpu.matmul %31, %32, %cst_15 {dimension_numbers = #tpu.dot_dimension_numbers<[1], [0], [0], [1], [0, 0, 1, 1], [], []>} : vector<2x128xbf16>, vector<128x128xbf16>, vector<2x128xf32> -> vector<2x128xf32>
    %c0_16 = arith.constant 0 : index
    %c0_17 = arith.constant 0 : index
    %34 = vector.load %arg6[%c0_16, %c0_17] : memref<2x128xf32, #tpu.memory_space<vmem>>, vector<2x128xf32>
    tpu.vector_store %arg6[%c0_16, %c0_17], %33 {strides = array<i32>} : memref<2x128xf32, #tpu.memory_space<vmem>>, vector<2x128xf32>,
    return
  }
}

</mosaic_0001>

<bundles_post_ra>
// kernel: tpu_custom_call.1
= control target key start
LH: loop header
LB: loop body
LE: loop exit
PB: predicated region body
PF: predicated region fallthrough
CT: control target
= control target key end

     0   :  { %11 = vsyncpa [#allocation3], 0  ;;  %s1442_s0 = inlined_call_operand.vmem [shape: s32[32,1], index: 0, kind: input, shape index: {}]   ;;  %s1443_s1 = inlined_call_operand.hbm [shape: bf16[128,128], index: 1, kind: input, shape index: {}]   ;;  %s1444_s2 = inlined_call_operand.hbm [shape: bf16[640,128], index: 2, kind: input, shape index: {}]   ;;  %s1445_s3 = inlined_call_operand.vmem [shape: f32[1,128], index: 3, kind: input, shape index: {}]   ;;  %s1446_s4 = inlined_call_operand.vmem [shape: s32[1,128], index: 4, kind: input, shape index: {}]   ;;  %s1447_s5 = inlined_call_operand.hbm [shape: bf16[128,128], index: 5, kind: input, shape index: {}]   ;;  %s1448_s6 = inlined_call_operand.hbm [shape: f32[2,128], index: 6, kind: output, shape index: {}]  }
   0x1   :  { %12 = vsyncpa [#allocation6], 0 }
   0x2   :  { %13 = vsyncpa [#allocation4], 0  ;;  %s1268_s21 = smov [#allocation5]   ;;  %s1269_s23 = smov [#allocation2]  }
   0x3   :  { %s33_s22 = sshll.u32 %s1268_s21, 4  ;;  %s21_s24 = sshll.u32 %s1269_s23, 4  ;;  %s34_s22 = int_to_ptr.vmem [resolvable:$true] %s33_s22  ;;  %s1313_s24 = int_to_ptr.vmem [resolvable:$true] %s21_s24 }
   0x4   :  { %s1174_s27 = scalar_lea.hbm %s1444_s2, 5120 }
   0x5   :  { %p1175_p0 = scmp.ne.s32.totalorder %s1444_s2, %s1174_s27  ;;  %p1178_p1 = scmp.lt.u32.totalorder %s1174_s27, %s1444_s2 }
   0x7   :  { %p1180_p2 = pnand %p1178_p1, %p1175_p0 }
   0x9   :  { %1183 = shalt.err (!%p1180_p2)
}
   0xa   :  { %s1184_s8 = scalar_lea.vmem %s34_s22, 5120  ;;  %p1189_p4 = scmp.lt.s32.totalorder %s34_s22, %s34_s22 }
   0xb   :  { %p1185_p3 = scmp.ne.s32.totalorder %s34_s22, %s1184_s8  ;;  %p1190_p5 = scmp.lt.s32.totalorder %s1184_s8, %s1184_s8 }
   0xd   :  { %p1191_p6 = por %p1190_p5, %p1189_p4 }
   0xf   :  { %p1192_p7 = pnand %p1191_p6, %p1185_p3 }
  0x11   :  { %1195 = shalt.err (!%p1192_p7)
}
  0x12   :  { %s1270_s9 = smov 64   ;;  %s1271_s10 = smov 4  }
  0x13   :  { %39 = dma.hbm_to_vmem [thread:$0]  %s1444_s2, 5120, %s34_s22, [#allocation6], %s1270_s9, %s1270_s9, %s1271_s10  }
  0x14   :  { %s1196_s15 = scalar_lea.hbm %s1443_s1, 1024 }
  0x15   :  { %p1197_p8 = scmp.ne.s32.totalorder %s1443_s1, %s1196_s15  ;;  %p1200_p9 = scmp.lt.u32.totalorder %s1196_s15, %s1443_s1 }
  0x17   :  { %p1202_p10 = pnand %p1200_p9, %p1197_p8 }
  0x19   :  { %1205 = shalt.err (!%p1202_p10)
}
  0x1a   :  { %s1206_s20 = scalar_lea.vmem %s1313_s24, 1024  ;;  %p1211_p12 = scmp.lt.s32.totalorder %s1313_s24, %s1313_s24 }
  0x1b   :  { %p1207_p11 = scmp.ne.s32.totalorder %s1313_s24, %s1206_s20  ;;  %p1212_p13 = scmp.lt.s32.totalorder %s1206_s20, %s1206_s20 }
  0x1d   :  { %p1213_p0 = por %p1212_p13, %p1211_p12 }
  0x1f   :  { %p1214_p1 = pnand %p1213_p0, %p1207_p11 }
  0x21   :  { %1217 = shalt.err (!%p1214_p1)
}
  0x22   :  { %27 = dma.hbm_to_vmem [thread:$0]  %s1443_s1, 1024, %s1313_s24, [#allocation3], %s1270_s9, %s1270_s9, %s1271_s10  }
  0x23   :  { %s1272_s22 = smov [#allocation7]   ;;  %s1218_s27 = scalar_lea.hbm %s1447_s5, 1024 }
  0x24   :  { %s49_s23 = sshll.u32 %s1272_s22, 4  ;;  %p1219_p2 = scmp.ne.s32.totalorder %s1447_s5, %s1218_s27  ;;  %s50_s23 = int_to_ptr.vmem [resolvable:$true] %s49_s23 }
  0x25   :  { %p1222_p3 = scmp.lt.u32.totalorder %s1218_s27, %s1447_s5 }
  0x27   :  { %p1224_p4 = pnand %p1222_p3, %p1219_p2 }
  0x29   :  { %1227 = shalt.err (!%p1224_p4)
}
  0x2a   :  { %s1228_s8 = scalar_lea.vmem %s50_s23, 1024  ;;  %p1233_p6 = scmp.lt.s32.totalorder %s50_s23, %s50_s23 }
  0x2b   :  { %p1229_p5 = scmp.ne.s32.totalorder %s50_s23, %s1228_s8  ;;  %p1234_p7 = scmp.lt.s32.totalorder %s1228_s8, %s1228_s8 }
  0x2d   :  { %p1235_p8 = por %p1234_p7, %p1233_p6 }
  0x2f   :  { %p1236_p9 = pnand %p1235_p8, %p1229_p5 }
  0x31   :  { %1239 = shalt.err (!%p1236_p9)
}
  0x32   :  { %55 = dma.hbm_to_vmem [thread:$0]  %s1447_s5, 1024, %s50_s23, [#allocation6], %s1270_s9, %s1270_s9, %s1271_s10  }
  0x33   :  { %1262 = dma.done.wait [#allocation3], 1024  }
  0x34   :  { %1263 = vsyncadd [#allocation3], 4294966272 }
  0x35   :  { %1264 = dma.done.wait [#allocation6], 6144  }
  0x36   :  { %1265 = vsyncadd [#allocation6], 4294961152  ;;  %v1273_v0 = vmov 0   ;;  %v68_v1 = vld [vmem:[%s1442_s0 + $0x10] sm:$0xff]  ;;  %v66_v2 = vld [vmem:[%s1442_s0] sm:$0xff]  ;;  %v70_v26 = vlaneseq  ;;  %vm1276_vm10 = vmmov 0  }
  0x37   :  { %1117 = vset.pattern.permute.xlu1 %v1273_v0  ;;  %1116 = vset.pattern.permute.xlu0 %v1273_v0  ;;  %v69_v3 = vld [vmem:[%s1442_s0 + $0x18] sm:$0xff]  ;;  %v67_v4 = vld [vmem:[%s1442_s0 + $0x8] sm:$0xff]  ;;  %v1118_v5 = vld [vmem:[#allocation2] sm:$0xff]   ;;  %v1274_v34 = vmov 1.0|1.0   ;;  %vm786_vm13 = vcmask 1041409  }
  0x38   :  { %79 = vperm.xlu1 %1117, %v68_v1   ;;  %73 = vperm.xlu0 %1116, %v66_v2   ;;  %v1119_v6 = vld [vmem:[#allocation2 + $0x8] sm:$0xff]   ;;  %v1120_v7 = vld [vmem:[#allocation2 + $0x10] sm:$0xff]   ;;  %v1121_v8 = vld [vmem:[#allocation2 + $0x18] sm:$0xff]   ;;  %v71_v29 = vand.u32 127, %v70_v26  ;;  %v1377_v53 = vshrl.u32 %v70_v26, 7  ;;  %s1277_s18 = smov [#allocation8]  }
  0x39   :  { %1046 = vmatprep.subr.bf16.mxu0 %v1118_v5  ;;  %v1126_v9 = vld [vmem:[#allocation5 + $0x40] sm:$0xff]   ;;  %v1130_v12 = vld [vmem:[#allocation5 + $0x48] sm:$0xff]   ;;  %v1134_v15 = vld [vmem:[#allocation5 + $0x50] sm:$0xff]   ;;  %s885_s19 = sshll.u32 %s1277_s18, 4  ;;  %s886_s19 = int_to_ptr.vmem [resolvable:$true] %s885_s19 }
  0x3a   :  { %1047 = vmatpush3.bf16.msra.mxu0 %v1118_v5  ;;  %971 = vmatprep.subr.bf16.mxu1 %v1126_v9  ;;  %v1127_v10 = vld [vmem:[#allocation5] sm:$0xff]   ;;  %v1131_v13 = vld [vmem:[#allocation5 + $0x8] sm:$0xff]   ;;  %v1135_v16 = vld [vmem:[#allocation5 + $0x10] sm:$0xff]   ;;  %vm217_vm6 = vcmp.lt.s32.totalorder %v1377_v53, 7  ;;  %vm235_vm7 = vcmp.lt.s32.totalorder %v1377_v53, 5  ;;  %vm226_vm8 = vcmp.lt.s32.totalorder %v1377_v53, 6  ;;  %p1245_p11 = scmp.lt.s32.totalorder %s886_s19, %s886_s19 }
  0x3b   :  { %1048 = vmatprep.subr.bf16.mxu0 %v1119_v6  ;;  %v1122_v11 = vld [vmem:[#allocation2 + $0x20] sm:$0xff]   ;;  %972 = vmatpush3.bf16.msra.mxu1 %v1127_v10  ;;  %v1123_v14 = vld [vmem:[#allocation2 + $0x28] sm:$0xff]   ;;  %v1124_v17 = vld [vmem:[#allocation2 + $0x30] sm:$0xff]   ;;  %vm244_vm9 = vcmp.lt.s32.totalorder %v1377_v53, 4 }
  0x3c   :  { %82 = vperm.xlu1 %1117, %v69_v3   ;;  %76 = vperm.xlu0 %1116, %v67_v4   ;;  %v1138_v18 = vld [vmem:[#allocation5 + $0x58] sm:$0xff]   ;;  %v1142_v21 = vld [vmem:[#allocation5 + $0x60] sm:$0xff]   ;;  %v1146_v24 = vld [vmem:[#allocation5 + $0x68] sm:$0xff]  }
  0x3d   :  { %973 = vmatprep.subr.bf16.mxu1 %v1130_v12  ;;  %v1139_v19 = vld [vmem:[#allocation5 + $0x18] sm:$0xff]   ;;  %v1143_v22 = vld [vmem:[#allocation5 + $0x20] sm:$0xff]   ;;  %v1147_v25 = vld [vmem:[#allocation5 + $0x28] sm:$0xff]  }
  0x3e   :  { %1049 = vmatpush3.bf16.msra.mxu0 %v1119_v6  ;;  %v1125_v20 = vld [vmem:[#allocation2 + $0x38] sm:$0xff]   ;;  %v1128_v23 = vld [vmem:[#allocation5 + $0xc0] sm:$0xff]   ;;  %v1132_v33 = vld [vmem:[#allocation5 + $0xc8] sm:$0xff]  }
  0x3f   :  { %1050 = vmatprep.subr.bf16.mxu0 %v1120_v7  ;;  %974 = vmatpush3.bf16.msra.mxu1 %v1131_v13  ;;  %v1129_v32 = vld [vmem:[#allocation5 + $0x80] sm:$0xff]   ;;  %v1133_v35 = vld [vmem:[#allocation5 + $0x88] sm:$0xff]   ;;  %v1136_v36 = vld [vmem:[#allocation5 + $0xd0] sm:$0xff]  }
  0x40   :  { %975 = vmatprep.subr.bf16.mxu1 %v1134_v15  ;;  %v1137_v37 = vld [vmem:[#allocation5 + $0x90] sm:$0xff]   ;;  %v1140_v38 = vld [vmem:[#allocation5 + $0xd8] sm:$0xff]   ;;  %v1144_v40 = vld [vmem:[#allocation5 + $0xe0] sm:$0xff]  }
  0x41   :  { %v1141_v39 = vld [vmem:[#allocation5 + $0x98] sm:$0xff]   ;;  %v1145_v41 = vld [vmem:[#allocation5 + $0xa0] sm:$0xff]   ;;  %v1148_v42 = vld [vmem:[#allocation5 + $0xe8] sm:$0xff]  }
  0x42   :  { %1051 = vmatpush3.bf16.msra.mxu0 %v1120_v7  ;;  %v1149_v43 = vld [vmem:[#allocation5 + $0xa8] sm:$0xff]   ;;  %v1150_v44 = vld [vmem:[#allocation5 + $0x70] sm:$0xff]   ;;  %v1154_v48 = vld [vmem:[#allocation5 + $0x78] sm:$0xff]  }
  0x43   :  { %1052 = vmatprep.subr.bf16.mxu0 %v1121_v8  ;;  %976 = vmatpush3.bf16.msra.mxu1 %v1135_v16  ;;  %v1151_v45 = vld [vmem:[#allocation5 + $0x30] sm:$0xff]   ;;  %v1155_v49 = vld [vmem:[#allocation5 + $0x38] sm:$0xff]   ;;  %v1158_v52 = vld [vmem:[#allocation5 + $0x100] sm:$0xff]  }
  0x44   :  { %977 = vmatprep.subr.bf16.mxu1 %v1138_v18  ;;  %v1152_v46 = vld [vmem:[#allocation5 + $0xf0] sm:$0xff]   ;;  %v1156_v50 = vld [vmem:[#allocation5 + $0xf8] sm:$0xff]  }
  0x45   :  { %v1153_v47 = vld [vmem:[#allocation5 + $0xb0] sm:$0xff]   ;;  %v1157_v51 = vld [vmem:[#allocation5 + $0xb8] sm:$0xff]  }
  0x46   :  { %1053 = vmatpush3.bf16.msra.mxu0 %v1121_v8 }
  0x47   :  { %1054 = vmatprep.subr.bf16.mxu0 %v1122_v11  ;;  %978 = vmatpush3.bf16.msra.mxu1 %v1139_v19 }
  0x48   :  { %979 = vmatprep.subr.bf16.mxu1 %v1142_v21 }
  0x4a   :  { %1055 = vmatpush3.bf16.msra.mxu0 %v1122_v11 }
  0x4b   :  { %1056 = vmatprep.subr.bf16.mxu0 %v1123_v14  ;;  %980 = vmatpush3.bf16.msra.mxu1 %v1143_v22 }
  0x4c   :  { %981 = vmatprep.subr.bf16.mxu1 %v1146_v24 }
  0x4e   :  { %1057 = vmatpush3.bf16.msra.mxu0 %v1123_v14 }
  0x4f   :  { %1058 = vmatprep.subr.bf16.mxu0 %v1124_v17  ;;  %982 = vmatpush3.bf16.msra.mxu1 %v1147_v25  ;;  %v1159_v25 = vld [vmem:[#allocation5 + $0x108] sm:$0xff]  }
  0x50   :  { %983 = vmatprep.subr.bf16.mxu1 %v1150_v44  ;;  %v1166_v44 = vld [vmem:[#allocation7] sm:$0xff]  }
  0x52   :  { %1059 = vmatpush3.bf16.msra.mxu0 %v1124_v17 }
  0x53   :  { %1060 = vmatprep.subr.bf16.mxu0 %v1125_v20  ;;  %984 = vmatpush3.bf16.msra.mxu1 %v1151_v45  ;;  %v1167_v45 = vld [vmem:[#allocation7 + $0x8] sm:$0xff]  }
  0x54   :  { %985 = vmatprep.subr.bf16.mxu1 %v1154_v48  ;;  %v1170_v48 = vld [vmem:[#allocation7 + $0x20] sm:$0xff]  }
  0x56   :  { %1061 = vmatpush3.bf16.msra.mxu0 %v1125_v20 }
  0x57   :  { %999 = vmatprep.subr.bf16.mxu0 %v1128_v23  ;;  %986 = vmatpush3.bf16.msra.mxu1 %v1155_v49  ;;  %v1171_v49 = vld [vmem:[#allocation7 + $0x28] sm:$0xff]  }
  0x58   :  { %1066 = vmatprep.subr.bf16.mxu1 %v1158_v52 }
  0xb7   :  { %v80_v27 = vpop.permute.xlu1 %79  ;;  %v74_v28 = vpop.permute.xlu0 %73 }
  0xb8   :  { %vm86_vm0 = vcmp.eq.s32.totalorder %v80_v27, %v71_v29  ;;  %vm84_vm3 = vcmp.eq.s32.totalorder %v74_v28, %v71_v29 }
  0xbb   :  { %v83_v30 = vpop.permute.xlu1 %82  ;;  %v77_v31 = vpop.permute.xlu0 %76 }
  0xbc   :  { %vm87_vm1 = vcmp.eq.s32.totalorder %v83_v30, %v71_v29  ;;  %vm85_vm2 = vcmp.eq.s32.totalorder %v77_v31, %v71_v29 }
  0xbd   :  { %vm909_vm4 = vmpackc.low %vm87_vm1, %vm86_vm0 }
  0xbe   :  { %vm907_vm5 = vmpackc.low %vm85_vm2, %vm84_vm3 }
  0xbf   :  { %1062 = vmatprep.mubr.msk.bf16.mxu0 %vm907_vm5, %v1274_v34 }
  0xc0   :  { %1063 = vmatmul.mubr.msk.bf16.vlgmr.msra.gmra.mrb[0].mxu0 %vm909_vm4, %v1274_v34 }
  0xc1   :  { %1000 = vmatpush3.bf16.msra.mxu0 %v1129_v32 }
  0xc2   :  { %1001 = vmatprep.subr.bf16.mxu0 %v1132_v33 }
  0xc5   :  { %1002 = vmatpush3.bf16.msra.mxu0 %v1133_v35 }
  0xc6   :  { %1003 = vmatprep.subr.bf16.mxu0 %v1136_v36  ;;  %v1160_v36 = vld [vmem:[#allocation5 + $0x110] sm:$0xff]  }
  0xc9   :  { %1004 = vmatpush3.bf16.msra.mxu0 %v1137_v37 }
  0xca   :  { %1005 = vmatprep.subr.bf16.mxu0 %v1140_v38  ;;  %v1161_v38 = vld [vmem:[#allocation5 + $0x118] sm:$0xff]  }
  0xcd   :  { %1006 = vmatpush3.bf16.msra.mxu0 %v1141_v39  ;;  %v1162_v39 = vld [vmem:[#allocation5 + $0x120] sm:$0xff]  }
  0xce   :  { %1007 = vmatprep.subr.bf16.mxu0 %v1144_v40  ;;  %v1163_v40 = vld [vmem:[#allocation5 + $0x128] sm:$0xff]  }
  0xd1   :  { %1008 = vmatpush3.bf16.msra.mxu0 %v1145_v41  ;;  %v1164_v41 = vld [vmem:[#allocation5 + $0x130] sm:$0xff]  }
  0xd2   :  { %1009 = vmatprep.subr.bf16.mxu0 %v1148_v42  ;;  %v1165_v42 = vld [vmem:[#allocation5 + $0x138] sm:$0xff]  }
  0xd5   :  { %1010 = vmatpush3.bf16.msra.mxu0 %v1149_v43  ;;  %v1275_v43 = vmov 0.0  }
  0xd6   :  { %1011 = vmatprep.subr.bf16.mxu0 %v1152_v46  ;;  %v1168_v46 = vld [vmem:[#allocation7 + $0x10] sm:$0xff]  }
  0xd9   :  { %1012 = vmatpush3.bf16.msra.mxu0 %v1153_v47  ;;  %v1169_v47 = vld [vmem:[#allocation7 + $0x18] sm:$0xff]  }
  0xda   :  { %1013 = vmatprep.subr.bf16.mxu0 %v1156_v50  ;;  %v1172_v50 = vld [vmem:[#allocation7 + $0x30] sm:$0xff]  }
  0xdd   :  { %1014 = vmatpush3.bf16.msra.mxu0 %v1157_v51  ;;  %v1173_v51 = vld [vmem:[#allocation7 + $0x38] sm:$0xff]  }
  0xde   :  { %1086 = vmatprep.subr.bf16.mxu0 %v1275_v43 }
 0x193   :  { %v1379_v54 = vpop.f32.mrb[0].mxu0 }
 0x194   :  { %v224_v55 = vrot.slane %v1379_v54, 2  ;;  %v233_v56 = vrot.slane %v1379_v54, 3  ;;  %v242_v57 = vrot.slane %v1379_v54, 4  ;;  %v196_v58 = vpop.f32.mrb[1].mxu0  ;;  %v213_v59 = vrot.slane %v1379_v54, 1 }
 0x195   :  { %v222_v60 = vrot.slane %v196_v58, 2  ;;  %v231_v61 = vrot.slane %v196_v58, 3  ;;  %v240_v62 = vrot.slane %v196_v58, 4  ;;  %v1065_v63 = vpop.f32.mrb[2].mxu0  ;;  %v211_v0 = vrot.slane %v196_v58, 1 }
 0x196   :  { %v214_v1 = vrot.slane %v1065_v63, 1  ;;  %v225_v2 = vrot.slane %v1065_v63, 2  ;;  %v234_v3 = vrot.slane %v1065_v63, 3  ;;  %v243_v4 = vrot.slane %v1065_v63, 4  ;;  %v199_v5 = vpop.f32.mrb[3].mxu0 }
 0x197   :  { %v223_v6 = vrot.slane %v199_v5, 2  ;;  %v232_v7 = vrot.slane %v199_v5, 3  ;;  %v241_v8 = vrot.slane %v199_v5, 4  ;;  %v212_v9 = vrot.slane %v199_v5, 1 }
 0x198   :  { %v249_v10 = vpack.c.bf16 %v199_v5, %v196_v58  ;;  %v218_v11 = vsel %vm217_vm6, %v213_v59, %v214_v1  ;;  %v221_v12 = vsel %vm217_vm6, %v214_v1, %v211_v0  ;;  %v236_v13 = vsel %vm235_vm7, %v233_v56, %v234_v3 }
 0x199   :  { %v219_v14 = vsel %vm217_vm6, %v212_v9, %v213_v59  ;;  %v220_v15 = vsel %vm217_vm6, %v211_v0, %v212_v9  ;;  %v237_v16 = vsel %vm235_vm7, %v232_v7, %v233_v56  ;;  %v238_v17 = vsel %vm235_vm7, %v231_v61, %v232_v7 }
 0x19a   :  { %v250_v18 = vpack.c.bf16 %v219_v14, %v220_v15  ;;  %v252_v19 = vpack.c.bf16 %v237_v16, %v238_v17  ;;  %v228_v20 = vsel %vm226_vm8, %v223_v6, %v224_v55  ;;  %v229_v21 = vsel %vm226_vm8, %v222_v60, %v223_v6 }
 0x19b   :  { %v251_v22 = vpack.c.bf16 %v228_v20, %v229_v21  ;;  %v255_v23 = vpack.c.bf16 %v221_v12, %v218_v11  ;;  %v239_v24 = vsel %vm235_vm7, %v234_v3, %v231_v61  ;;  %v254_v26 = vpack.c.bf16 %v1065_v63, %v1379_v54 }
 0x19c   :  { %611 = vmatprep.mubr.bf16.mxu1 %v250_v18  ;;  %660 = vmatprep.mubr.bf16.mxu0 %v252_v19  ;;  %v257_v27 = vpack.c.bf16 %v239_v24, %v236_v13  ;;  %v227_v28 = vsel %vm226_vm8, %v224_v55, %v225_v2  ;;  %v230_v29 = vsel %vm226_vm8, %v225_v2, %v222_v60  ;;  %v726_v17 = vadd.s32 8, %v1377_v53  ;;  %v951_v18 = vld [vmem:[%s1446_s4] ss:$0 sm:$0xff] }
 0x19d   :  { %612 = vmatmul.mubr.bf16.vlgmr.msra.gmra.mrb[0].mxu1 %v249_v10  ;;  %661 = vmatmul.mubr.bf16.vlgmr.msra.gmra.mrb[4].mxu0 %v251_v22  ;;  %v256_v30 = vpack.c.bf16 %v230_v29, %v227_v28  ;;  %v246_v31 = vsel %vm244_vm9, %v241_v8, %v242_v57  ;;  %v247_v32 = vsel %vm244_vm9, %v240_v62, %v241_v8 }
 0x19e   :  { %1067 = vmatpush3.bf16.msra.mxu1 %v1158_v52  ;;  %619 = vmatprep.mubr.bf16.mxu1 %v255_v23  ;;  %v253_v33 = vpack.c.bf16 %v246_v31, %v247_v32  ;;  %v245_v34 = vsel %vm244_vm9, %v242_v57, %v243_v4  ;;  %v248_v35 = vsel %vm244_vm9, %v243_v4, %v240_v62 }
 0x19f   :  { %668 = vmatprep.mubr.bf16.mxu0 %v257_v27  ;;  %1068 = vmatprep.subr.bf16.mxu1 %v1159_v25  ;;  %v258_v37 = vpack.c.bf16 %v248_v35, %v245_v34  ;;  %vm732_vm11 = vcmp.le.s32.totalorder %v1377_v53, %v951_v18  ;;  %vm733_vm12 = vcmp.le.s32.totalorder %v726_v17, %v951_v18 }
 0x1a0   :  { %1087 = vmatpush3.bf16.msra.mxu0 %v1166_v44 }
 0x1a1   :  { %1088 = vmatprep.subr.bf16.mxu0 %v1275_v43 }
 0x1a2   :  { %1069 = vmatpush3.bf16.msra.mxu1 %v1159_v25 }
 0x1a3   :  { %1070 = vmatprep.subr.bf16.mxu1 %v1160_v36 }
 0x1a4   :  { %1089 = vmatpush3.bf16.msra.mxu0 %v1167_v45 }
 0x1a5   :  { %620 = vmatmul.mubr.bf16.gmra.mrb[4].mxu1 %v254_v26  ;;  %669 = vmatmul.mubr.bf16.gmra.mrb[8].mxu0 %v256_v30 }
 0x1a6   :  { %1071 = vmatpush3.bf16.msra.mxu1 %v1160_v36  ;;  %1082 = vmatprep.mubr.bf16.mxu1 %v253_v33 }
 0x1a7   :  { %1072 = vmatprep.subr.bf16.mxu1 %v1161_v38  ;;  %1090 = vmatprep.subr.bf16.mxu0 %v1275_v43 }
 0x1a8   :  { %1091 = vmatpush3.bf16.msra.mxu0 %v1168_v46  ;;  %1102 = vmatprep.mubr.msk.bf16.mxu0 %vm1276_vm10, %v1275_v43 }
 0x1a9   :  { %1092 = vmatprep.subr.bf16.mxu0 %v1275_v43 }
 0x1aa   :  { %1073 = vmatpush3.bf16.msra.mxu1 %v1161_v38 }
 0x1ab   :  { %1074 = vmatprep.subr.bf16.mxu1 %v1162_v39 }
 0x1ac   :  { %1093 = vmatpush3.bf16.msra.mxu0 %v1169_v47 }
 0x1ad   :  { %1094 = vmatprep.subr.bf16.mxu0 %v1275_v43 }
 0x1ae   :  { %1075 = vmatpush3.bf16.msra.mxu1 %v1162_v39 }
 0x1af   :  { %1076 = vmatprep.subr.bf16.mxu1 %v1163_v40 }
 0x1b0   :  { %1095 = vmatpush3.bf16.msra.mxu0 %v1170_v48 }
 0x1b1   :  { %1096 = vmatprep.subr.bf16.mxu0 %v1275_v43 }
 0x1b2   :  { %1077 = vmatpush3.bf16.msra.mxu1 %v1163_v40 }
 0x1b3   :  { %1078 = vmatprep.subr.bf16.mxu1 %v1164_v41 }
 0x1b4   :  { %1097 = vmatpush3.bf16.msra.mxu0 %v1171_v49 }
 0x1b5   :  { %1098 = vmatprep.subr.bf16.mxu0 %v1275_v43 }
 0x1b6   :  { %1079 = vmatpush3.bf16.msra.mxu1 %v1164_v41  ;;  %v952_v41 = vld [vmem:[%s1445_s3] ss:$0 sm:$0xff]  ;;  %s1240_s3 = scalar_lea.vmem %s886_s19, 32 }
 0x1b7   :  { %1080 = vmatprep.subr.bf16.mxu1 %v1165_v42  ;;  %p1241_p10 = scmp.ne.s32.totalorder %s886_s19, %s1240_s3  ;;  %p1246_p12 = scmp.lt.s32.totalorder %s1240_s3, %s1240_s3 }
 0x1b8   :  { %1099 = vmatpush3.bf16.msra.mxu0 %v1172_v50 }
 0x1b9   :  { %1100 = vmatprep.subr.bf16.mxu0 %v1275_v43  ;;  %p1247_p13 = por %p1246_p12, %p1245_p11 }
 0x1ba   :  { %1081 = vmatpush3.bf16.msra.mxu1 %v1165_v42 }
 0x1bb   :  { %p1248_p0 = pnand %p1247_p13, %p1241_p10 }
 0x1bc   :  { %1101 = vmatpush3.bf16.msra.mxu0 %v1173_v51 }
 0x1bd   :  { %1083 = vmatmul.mubr.bf16.vlgmr.msra.gmra.mrb[8].mxu1 %v258_v37 }
 0x270   :  { %v987_v52 = vpop.f32.mrb[0].mxu1  ;;  %v1015_v54 = vpop.f32.mrb[4].mxu0 }
 0x271   :  { %v988_v55 = vpop.f32.mrb[1].mxu1  ;;  %v1016_v56 = vpop.f32.mrb[5].mxu0 }
 0x272   :  { %v989_v57 = vadd.f32 %v988_v55, %v987_v52  ;;  %v1017_v58 = vadd.f32 %v1016_v56, %v1015_v54  ;;  %v990_v59 = vpop.f32.mrb[2].mxu1  ;;  %v1018_v60 = vpop.f32.mrb[6].mxu0 }
 0x273   :  { %v991_v61 = vpop.f32.mrb[3].mxu1  ;;  %v1019_v62 = vpop.f32.mrb[7].mxu0 }
 0x274   :  { %v992_v63 = vadd.f32 %v991_v61, %v990_v59  ;;  %v1020_v0 = vadd.f32 %v1019_v62, %v1018_v60  ;;  %v663_v1 = vadd.f32 %v1017_v58, %v989_v57 }
 0x276   :  { %v666_v2 = vadd.f32 %v1020_v0, %v992_v63 }
 0x278   :  { %v993_v3 = vpop.f32.mrb[4].mxu1  ;;  %v1021_v4 = vpop.f32.mrb[8].mxu0 }
 0x279   :  { %v994_v5 = vpop.f32.mrb[5].mxu1  ;;  %v1022_v6 = vpop.f32.mrb[9].mxu0 }
 0x27a   :  { %v995_v7 = vadd.f32 %v994_v5, %v993_v3  ;;  %v1023_v8 = vadd.f32 %v1022_v6, %v1021_v4  ;;  %v996_v9 = vpop.f32.mrb[6].mxu1  ;;  %v1024_v10 = vpop.f32.mrb[10].mxu0 }
 0x27b   :  { %v997_v11 = vpop.f32.mrb[7].mxu1  ;;  %v1025_v12 = vpop.f32.mrb[11].mxu0 }
 0x27c   :  { %v998_v13 = vadd.f32 %v997_v11, %v996_v9  ;;  %v1026_v14 = vadd.f32 %v1025_v12, %v1024_v10  ;;  %v671_v15 = vadd.f32 %v1023_v8, %v995_v7 }
 0x27e   :  { %v674_v16 = vadd.f32 %v1026_v14, %v998_v13 }
 0x290   :  { %v1084_v19 = vpop.f32.mrb[8].mxu1 }
 0x291   :  { %v720_v20 = vadd.f32 %v1084_v19, %v671_v15  ;;  %v711_v21 = vpop.f32.mrb[9].mxu1 }
 0x292   :  { %v712_v22 = vadd.f32 %v711_v21, %v663_v1  ;;  %v1085_v23 = vpop.f32.mrb[10].mxu1 }
 0x293   :  { %v723_v24 = vadd.f32 %v1085_v23, %v674_v16  ;;  %v714_v25 = vpop.f32.mrb[11].mxu1  ;;  %v736_v27 = vsel %vm732_vm11, %v720_v20, -1e+30 }
 0x294   :  { %v715_v26 = vadd.f32 %v714_v25, %v666_v2  ;;  %v734_v29 = vsel %vm732_vm11, %v712_v22, -1e+30 }
 0x295   :  { %v737_v28 = vsel %vm733_vm12, %v723_v24, -1e+30 }
 0x296   :  { %v745_v30 = vmax.f32 %v736_v27, %v737_v28  ;;  %v735_v31 = vsel %vm733_vm12, %v715_v26, -1e+30 }
 0x297   :  { %v738_v32 = vmax.f32 %v734_v29, %v735_v31 }
 0x298   :  { %v746_v33 = vrot.slane %v745_v30, 4 }
 0x299   :  { %v739_v34 = vrot.slane %v738_v32, 4 }
 0x29a   :  { %v747_v35 = vmax.f32 %v745_v30, %v746_v33 }
 0x29b   :  { %v740_v36 = vmax.f32 %v738_v32, %v739_v34 }
 0x29c   :  { %v748_v37 = vrot.slane %v747_v35, 2 }
 0x29d   :  { %v741_v38 = vrot.slane %v740_v36, 2 }
 0x29e   :  { %v749_v39 = vmax.f32 %v747_v35, %v748_v37 }
 0x29f   :  { %v742_v53 = vmax.f32 %v740_v36, %v741_v38 }
 0x2a0   :  { %v750_v40 = vrot.slane %v749_v39, 1 }
 0x2a1   :  { %v743_v42 = vrot.slane %v742_v53, 1 }
 0x2a2   :  { %v751_v43 = vmax.f32 %v749_v39, %v750_v40 }
 0x2a3   :  { %v744_v44 = vmax.f32 %v742_v53, %v743_v42 }
 0x2a4   :  { %v760_v45 = vadd.f32 %v952_v41, %v751_v43 }
 0x2a5   :  { %v759_v46 = vadd.f32 %v952_v41, %v744_v44 }
 0x2a6   :  { %v762_v47 = vmax.f32 %v760_v45, 0.0 }
 0x2a7   :  { %v761_v48 = vmax.f32 %v759_v46, 0.0 }
 0x2a8   :  { %v764_v49 = vpack.c.bf16 %v762_v47, %v762_v47 }
 0x2a9   :  { %v763_v50 = vpack.c.bf16 %v761_v48, %v761_v48 }
 0x2aa   :  { %v784_v51 = vunpack.c.l.b16 %v764_v49 }
 0x2ab   :  { %v783_v52 = vunpack.c.l.b16 %v763_v50 }
 0x2ac   :  { %v785_v54 = vrot.slane %v784_v51, 7 }
 0x2ae   :  { %v787_v55 = vsel %vm786_vm13, %v785_v54, %v783_v52 }
 0x2af   :  { %v788_v56 = vpack.c.b16 %v787_v55, %v787_v55 }
 0x2b1   :  { %1103 = vmatmul.mubr.bf16.vlgmr.msra.gmra.mrb[12].mxu0 %v788_v56 }
 0x384   :  { %v872_v57 = vpop.f32.mrb[12].mxu0 }
 0x385   :  { %878 = vst [vmem:[#allocation8] sm:$0x3] %v872_v57  ;;  %v1104_v58 = vpop.f32.mrb[13].mxu0 }
 0x386   :  { %v875_v59 = vpop.f32.mrb[14].mxu0 }
 0x387   :  { %1251 = shalt.err (!%p1248_p0)
}
 0x388   :  { %s1252_s21 = scalar_lea.hbm %s1448_s6, 32 }
 0x389   :  { %p1253_p1 = scmp.ne.s32.totalorder %s1448_s6, %s1252_s21  ;;  %p1256_p2 = scmp.lt.u32.totalorder %s1252_s21, %s1448_s6 }
 0x38b   :  { %p1258_p3 = pnand %p1256_p2, %p1253_p1 }
 0x38d   :  { %1261 = shalt.err (!%p1258_p3)
}
 0x38e   :  { %888 = dma.vmem_to_hbm [thread:$0]  %s886_s19, 32, %s1448_s6, [#allocation4]   ;;  %v1105_v60 = vpop.f32.mrb[15].mxu0 }
 0x38f   :  { %1266 = dma.done.wait [#allocation4], 32  }
 0x390   :  { %1267 = vsyncadd [#allocation4], 4294967264 }
 0x391   :  { %892 = vsyncpa [#allocation3], 1 }
 0x392   :  { %893 = vsyncpa [#allocation6], 1 }
 0x393   :  { %894 = vsyncpa [#allocation4], 1 }

</bundles_post_ra>
